<compile_context>
chip_gen: v5e
topology: v5e:2x2
jax: 0.10.0
libtpu: 0.0.40
codegen_flags: <defaults>
</compile_context>

<pallas_src>
import functools

import jax
import jax.numpy as jnp
from jax.experimental import pallas as pl
from jax.experimental.pallas import tpu as pltpu


def _round_up(a, m):
    return ((a + m - 1) // m) * m


# --------------------------------------------------------------------------
# Kernel: fused MLP over one (TM, k_in) batch tile.  All layers unrolled.
# --------------------------------------------------------------------------
def mlp_kernel(x_ref, *refs):
    """refs = (w_0, b_0, w_1, b_1, ..., w_{L-1}, b_{L-1}, o_ref).

    x_ref : (TM, k_in)   input dtype (f32), cast to bf16 on-chip.
    w_l   : (k_l, n_l)   bf16, per-layer zero-padded (k_l mult 16, n_l mult 128).
    b_l   : (1,  n_l)    f32 row, broadcasts over sublanes.
    o_ref : (TM, n_last) f32, lane-dense.
    """
    o_ref = refs[-1]
    num_layers = (len(refs) - 1) // 2
    # Cast on-chip (VPU) instead of materializing a bf16 copy of x in HBM.
    h = x_ref[...].astype(jnp.bfloat16)
    for l in range(num_layers):                       # static unroll over layers
        w_ref, b_ref = refs[2 * l], refs[2 * l + 1]
        acc = jnp.dot(h, w_ref[...], preferred_element_type=jnp.float32)
        acc = acc + b_ref[...]                        # (1, n_l) lane-row broadcast
        if l != num_layers - 1:
            # bf16 activations + bf16 weights with f32 accumulation is the
            # MXU-native fast path (intentional precision trade-off vs the
            # f32 torch MLP; keep h in f32 here if closer parity is required).
            h = jnp.maximum(acc, 0.0).astype(jnp.bfloat16)
        else:
            o_ref[...] = acc.astype(o_ref.dtype)      # lane-dense f32 store


# --------------------------------------------------------------------------
# Parameter setup (hoisted out of the forward pass).
# --------------------------------------------------------------------------
def init_mlp_params(key, dim_in, dim_out, dim_hidden, num_layers, bias=True):
    """PyTorch-Linear-style init: U[-1/sqrt(fan_in), 1/sqrt(fan_in)].
    Weights stored as (in, out) == transpose of torch's (out, in)."""
    weights, biases = [], []
    for l in range(num_layers):
        d_in = dim_in if l == 0 else dim_hidden
        d_out = dim_out if l == num_layers - 1 else dim_hidden
        key, kw, kb = jax.random.split(key, 3)
        bound = 1.0 / jnp.sqrt(jnp.float32(d_in))
        w = jax.random.uniform(kw, (d_in, d_out), jnp.float32, -bound, bound)
        b = (jax.random.uniform(kb, (d_out,), jnp.float32, -bound, bound)
             if bias else jnp.zeros((d_out,), jnp.float32))
        weights.append(w)
        biases.append(b)
    return weights, biases


def pack_mlp_params(weights, biases):
    """Per-layer zero padding, done ONCE at setup time.

    * layer 0's K is padded only to the bf16 sublane multiple (16), so the
      first matmul contracts over ~dim_in rows, not the global max dim;
    * every output width is padded to a lane multiple (128) -> unmasked stores
      and the zero-pad invariant (padded lanes stay exactly 0 through
      bias + ReLU) holds layer to layer;
    * weights are bf16 (MXU-native), biases stay f32 rows (1, n_l).

    NOTE (v6e/v7x): for hidden dims >= 256, padding K/N to multiples of 256
    slightly improves per-vmatmul MXU occupancy; 128 is kept here (optimal for
    v5e and avoids inflating FLOPs for e.g. 384-wide layers).
    TODO(synk): optional fp8 weight packing for v7x (bf16 x fp8 MXU) when the
    accuracy budget allows; not available on v5e/v6e.
    """
    w_list, b_list = [], []
    for l, (w, b) in enumerate(zip(weights, biases)):
        d_in, d_out = w.shape
        k_pad = _round_up(d_in, 16 if l == 0 else 128)
        n_pad = _round_up(d_out, 128)
        wp = jnp.zeros((k_pad, n_pad), jnp.float32).at[:d_in, :d_out].set(w)
        w_list.append(wp.astype(jnp.bfloat16))
        b_list.append(jnp.zeros((1, n_pad), jnp.float32).at[0, :d_out].set(b))
    return tuple(w_list), tuple(b_list)


# --------------------------------------------------------------------------
# Forward wrapper: batch-tiled pallas_call.
# --------------------------------------------------------------------------
@functools.partial(jax.jit,
                   static_argnames=("dim_out", "tm", "single_buffer_weights"))
def _mlp_forward_impl(x, params_flat, *, dim_out, tm, single_buffer_weights):
    n, d_in = x.shape
    w_list = params_flat[0::2]
    b_list = params_flat[1::2]
    k_in = w_list[0].shape[0]           # round_up(dim_in, 16)
    dout_pad = w_list[-1].shape[1]      # round_up(dim_out, 128)
    max_n = max(w.shape[1] for w in w_list)

    n_pad = _round_up(max(n, tm), tm)
    # Cheap edge padding only: rows up to the tile multiple, lanes up to the
    # packed layer-0 K.  No full (N, Dpad) copy, no wrapper-side dtype cast.
    if n_pad != n or k_in != d_in:
        x = jnp.pad(x, ((0, n_pad - n), (0, k_in - d_in)))

    # Explicit VMEM budget: <= 48 MiB is safe on v7x (64 MiB physical) and
    # raises v5e's 16 MiB default scoped limit.
    w_buffers = 1 if single_buffer_weights else 2
    resident = (sum(int(w.size) * w.dtype.itemsize for w in w_list)
                + sum(int(b.size) * b.dtype.itemsize for b in b_list))
    est = (w_buffers * resident
           + 2 * tm * k_in * x.dtype.itemsize        # x tile, double-buffered
           + 2 * tm * dout_pad * 4                   # out tile, double-buffered
           + 4 * tm * max_n * 4)                     # f32 accumulators / activations
    vmem_limit = int(min(48 << 20, max(32 << 20, 2 * est)))
    # TODO(synk): if the resident weight stack ever exceeds this budget (very
    # deep/wide configs), stream layers with a second "arbitrary" grid axis.

    if single_buffer_weights:
        # Constant index_map -> nothing to overlap; 1 buffer halves weight VMEM.
        def resident_spec(shp):
            return pl.BlockSpec(shp, lambda i: (0, 0),
                                pipeline_mode=pl.Buffered(1))
    else:
        def resident_spec(shp):
            return pl.BlockSpec(shp, lambda i: (0, 0))

    in_specs = [pl.BlockSpec((tm, k_in), lambda i: (i, 0))]     # x: tiled over N
    for w, b in zip(w_list, b_list):
        in_specs.append(resident_spec(w.shape))                 # VMEM-resident W
        in_specs.append(resident_spec(b.shape))                 # VMEM-resident b

    out_p = pl.pallas_call(
        mlp_kernel,
        grid=(n_pad // tm,),
        in_specs=in_specs,
        out_specs=pl.BlockSpec((tm, dout_pad), lambda i: (i, 0)),  # lane-dense
        out_shape=jax.ShapeDtypeStruct((n_pad, dout_pad), jnp.float32),
        compiler_params=pltpu.CompilerParams(
            dimension_semantics=("parallel",),    # batch rows are independent
            vmem_limit_bytes=vmem_limit,
        ),
    )(x, *params_flat)

    return out_p[:n, :dim_out]


_SINGLE_BUFFER_WEIGHTS = True   # flipped off if this jax build rejects Buffered(1)


def mlp_forward(x, w_list, b_list, *, dim_out, tm=None):
    """Forward pass.  x: (N, dim_in) f32 -> (N, dim_out) f32."""
    global _SINGLE_BUFFER_WEIGHTS
    n = x.shape[0]
    max_n = max(w.shape[1] for w in w_list)

    if tm is None:
        # Big tiles amortize the ~0.35 us per-grid-step pipeline overhead.
        tm = 2048 if max_n <= 256 else 1024
    tm = _round_up(tm, 16)                       # bf16 packs 16 rows per vreg
    # Keep >= 2 grid steps whenever the batch allows it: on v7x the batch axis
    # is the only "parallel" axis, and a grid of (1,) idles one TensorCore.
    tm = min(tm, _round_up(max(pl.cdiv(n, 2), 16), 16))

    params_flat = tuple(p for wb in zip(w_list, b_list) for p in wb)

    if _SINGLE_BUFFER_WEIGHTS:
        try:
            return _mlp_forward_impl(x, params_flat, dim_out=dim_out, tm=tm,
                                     single_buffer_weights=True)
        except Exception:
            # pl.Buffered(1) unsupported on this jax build; fall back to the
            # default double-buffered resident weights.
            _SINGLE_BUFFER_WEIGHTS = False
    return _mlp_forward_impl(x, params_flat, dim_out=dim_out, tm=tm,
                             single_buffer_weights=False)


# --------------------------------------------------------------------------
# Pure-JAX references.
# --------------------------------------------------------------------------
def mlp_reference(x, weights, biases, dtype=jnp.float32):
    h = x.astype(dtype)
    for l, (w, b) in enumerate(zip(weights, biases)):
        h = jnp.dot(h, w.astype(dtype), preferred_element_type=jnp.float32) + b
        if l != len(weights) - 1:
            h = jnp.maximum(h, 0.0).astype(dtype)
    return h.astype(jnp.float32)


if __name__ == "__main__":
    # MLP(dim_in=16, dim_out=16, dim_hidden=32, num_layers=3), batch N=256
    dim_in, dim_out, dim_hidden, num_layers = 16, 16, 32, 3
    N = 256

    key = jax.random.PRNGKey(0)
    key, kx = jax.random.split(key)
    x = jax.random.normal(kx, (N, dim_in), jnp.float32)

    weights, biases = init_mlp_params(key, dim_in, dim_out, dim_hidden,
                                      num_layers, bias=True)
    w_list, b_list = pack_mlp_params(weights, biases)      # packed once, reused

    # Default tile logic picks tm=128 here -> grid=(2,), exercising the batch
    # pipeline (and both TCs on v7x).
    out = mlp_forward(x, w_list, b_list, dim_out=dim_out)
    out = jax.block_until_ready(out)

    ref_bf16 = mlp_reference(x, weights, biases, dtype=jnp.bfloat16)  # same precision path
    ref_f32 = mlp_reference(x, weights, biases, dtype=jnp.float32)    # full-precision torch semantics

    assert out.shape == (N, dim_out), out.shape
    assert jnp.allclose(out, ref_bf16, atol=2e-3, rtol=2e-2), "mismatch vs bf16 reference"
    assert jnp.allclose(out, ref_f32, atol=1e-1, rtol=1e-1), "mismatch vs f32 reference"

    print("KERNEL_OK")
</pallas_src>

<mosaic_0001>
module attributes {stable_mosaic.version = 11 : i64} {
  func.func @mlp_kernel(%arg0: i32, %arg1: memref<128x16xf32, #tpu.memory_space<vmem>>, %arg2: memref<16x128xbf16, #tpu.memory_space<vmem>>, %arg3: memref<1x128xf32, #tpu.memory_space<vmem>>, %arg4: memref<128x128xbf16, #tpu.memory_space<vmem>>, %arg5: memref<1x128xf32, #tpu.memory_space<vmem>>, %arg6: memref<128x128xbf16, #tpu.memory_space<vmem>>, %arg7: memref<1x128xf32, #tpu.memory_space<vmem>>, %arg8: memref<128x128xf32, #tpu.memory_space<vmem>>) attributes {dimension_semantics = [#tpu.dimension_semantics<parallel>], iteration_bounds = array<i64: 2>, scalar_prefetch = 0 : i64, scratch_operands = 0 : i64, tpu.core_type = #tpu.core_type<tc>, window_params = [{transform_indices = @transform_0, window_bounds = array<i64: 128, 16>}, {pipeline_mode = #tpu.pipeline_mode<synchronous>, transform_indices = @transform_1, window_bounds = array<i64: 16, 128>}, {pipeline_mode = #tpu.pipeline_mode<synchronous>, transform_indices = @transform_2, window_bounds = array<i64: 1, 128>}, {pipeline_mode = #tpu.pipeline_mode<synchronous>, transform_indices = @transform_3, window_bounds = array<i64: 128, 128>}, {pipeline_mode = #tpu.pipeline_mode<synchronous>, transform_indices = @transform_4, window_bounds = array<i64: 1, 128>}, {pipeline_mode = #tpu.pipeline_mode<synchronous>, transform_indices = @transform_5, window_bounds = array<i64: 128, 128>}, {pipeline_mode = #tpu.pipeline_mode<synchronous>, transform_indices = @transform_6, window_bounds = array<i64: 1, 128>}, {transform_indices = @transform_7, window_bounds = array<i64: 128, 128>}]} {
    %c0 = arith.constant 0 : index
    %c0_0 = arith.constant 0 : index
    %0 = vector.load %arg1[%c0, %c0_0] : memref<128x16xf32, #tpu.memory_space<vmem>>, vector<128x16xf32>
    %1 = arith.truncf %0 : vector<128x16xf32> to vector<128x16xbf16>
    %c0_1 = arith.constant 0 : index
    %c0_2 = arith.constant 0 : index
    %2 = vector.load %arg2[%c0_1, %c0_2] : memref<16x128xbf16, #tpu.memory_space<vmem>>, vector<16x128xbf16>
    %cst = arith.constant dense<0.000000e+00> : vector<128x128xf32>
    %3 = tpu.matmul %1, %2, %cst {dimension_numbers = #tpu.dot_dimension_numbers<[1], [0], [0], [1], [0, 0, 1, 1], [], []>} : vector<128x16xbf16>, vector<16x128xbf16>, vector<128x128xf32> -> vector<128x128xf32>
    %c0_3 = arith.constant 0 : index
    %c0_4 = arith.constant 0 : index
    %4 = vector.load %arg3[%c0_3, %c0_4] : memref<1x128xf32, #tpu.memory_space<vmem>>, vector<1x128xf32>
    %5 = vector.broadcast %4 : vector<1x128xf32> to vector<128x128xf32>
    %6 = arith.addf %3, %5 : vector<128x128xf32>
    %cst_5 = arith.constant 0.000000e+00 : f32
    %7 = vector.broadcast %cst_5 : f32 to vector<128x128xf32>
    %8 = arith.maximumf %6, %7 : vector<128x128xf32>
    %9 = arith.truncf %8 : vector<128x128xf32> to vector<128x128xbf16>
    %c0_6 = arith.constant 0 : index
    %c0_7 = arith.constant 0 : index
    %10 = vector.load %arg4[%c0_6, %c0_7] : memref<128x128xbf16, #tpu.memory_space<vmem>>, vector<128x128xbf16>
    %cst_8 = arith.constant dense<0.000000e+00> : vector<128x128xf32>
    %11 = tpu.matmul %9, %10, %cst_8 {dimension_numbers = #tpu.dot_dimension_numbers<[1], [0], [0], [1], [0, 0, 1, 1], [], []>} : vector<128x128xbf16>, vector<128x128xbf16>, vector<128x128xf32> -> vector<128x128xf32>
    %c0_9 = arith.constant 0 : index
    %c0_10 = arith.constant 0 : index
    %12 = vector.load %arg5[%c0_9, %c0_10] : memref<1x128xf32, #tpu.memory_space<vmem>>, vector<1x128xf32>
    %13 = vector.broadcast %12 : vector<1x128xf32> to vector<128x128xf32>
    %14 = arith.addf %11, %13 : vector<128x128xf32>
    %cst_11 = arith.constant 0.000000e+00 : f32
    %15 = vector.broadcast %cst_11 : f32 to vector<128x128xf32>
    %16 = arith.maximumf %14, %15 : vector<128x128xf32>
    %17 = arith.truncf %16 : vector<128x128xf32> to vector<128x128xbf16>
    %c0_12 = arith.constant 0 : index
    %c0_13 = arith.constant 0 : index
    %18 = vector.load %arg6[%c0_12, %c0_13] : memref<128x128xbf16, #tpu.memory_space<vmem>>, vector<128x128xbf16>
    %cst_14 = arith.constant dense<0.000000e+00> : vector<128x128xf32>
    %19 = tpu.matmul %17, %18, %cst_14 {dimension_numbers = #tpu.dot_dimension_numbers<[1], [0], [0], [1], [0, 0, 1, 1], [], []>} : vector<128x128xbf16>, vector<128x128xbf16>, vector<128x128xf32> -> vector<128x128xf32>
    %c0_15 = arith.constant 0 : index
    %c0_16 = arith.constant 0 : index
    %20 = vector.load %arg7[%c0_15, %c0_16] : memref<1x128xf32, #tpu.memory_space<vmem>>, vector<1x128xf32>
    %21 = vector.broadcast %20 : vector<1x128xf32> to vector<128x128xf32>
    %22 = arith.addf %19, %21 : vector<128x128xf32>
    %c0_17 = arith.constant 0 : index
    %c0_18 = arith.constant 0 : index
    %23 = vector.load %arg8[%c0_17, %c0_18] : memref<128x128xf32, #tpu.memory_space<vmem>>, vector<128x128xf32>
    tpu.vector_store %arg8[%c0_17, %c0_18], %22 {strides = array<i32>} : memref<128x128xf32, #tpu.memory_space<vmem>>, vector<128x128xf32>,
    return
  }
  func.func @transform_0(%arg0: i32) -> (i32, i32) {
    %c0_i32 = arith.constant 0 : i32
    %c0_i32_0 = arith.constant 0 : i32
    return %arg0, %c0_i32 : i32, i32
  }
  func.func @transform_1(%arg0: i32) -> (i32, i32) {
    %c0_i32 = arith.constant 0 : i32
    %c0_i32_0 = arith.constant 0 : i32
    %c0_i32_1 = arith.constant 0 : i32
    return %c0_i32, %c0_i32_0 : i32, i32
  }
  func.func @transform_2(%arg0: i32) -> (i32, i32) {
    %c0_i32 = arith.constant 0 : i32
    %c0_i32_0 = arith.constant 0 : i32
    %c0_i32_1 = arith.constant 0 : i32
    return %c0_i32, %c0_i32_0 : i32, i32
  }
  func.func @transform_3(%arg0: i32) -> (i32, i32) {
    %c0_i32 = arith.constant 0 : i32
    %c0_i32_0 = arith.constant 0 : i32
    %c0_i32_1 = arith.constant 0 : i32
    return %c0_i32, %c0_i32_0 : i32, i32
  }
  func.func @transform_4(%arg0: i32) -> (i32, i32) {
    %c0_i32 = arith.constant 0 : i32
    %c0_i32_0 = arith.constant 0 : i32
    %c0_i32_1 = arith.constant 0 : i32
    return %c0_i32, %c0_i32_0 : i32, i32
  }
  func.func @transform_5(%arg0: i32) -> (i32, i32) {
    %c0_i32 = arith.constant 0 : i32
    %c0_i32_0 = arith.constant 0 : i32
    %c0_i32_1 = arith.constant 0 : i32
    return %c0_i32, %c0_i32_0 : i32, i32
  }
  func.func @transform_6(%arg0: i32) -> (i32, i32) {
    %c0_i32 = arith.constant 0 : i32
    %c0_i32_0 = arith.constant 0 : i32
    %c0_i32_1 = arith.constant 0 : i32
    return %c0_i32, %c0_i32_0 : i32, i32
  }
  func.func @transform_7(%arg0: i32) -> (i32, i32) {
    %c0_i32 = arith.constant 0 : i32
    %c0_i32_0 = arith.constant 0 : i32
    return %arg0, %c0_i32 : i32, i32
  }
}

module attributes {stable_mosaic.version = 11 : i64} {
  func.func @mlp_kernel(%arg0: i32, %arg1: memref<128x16xf32, #tpu.memory_space<vmem>>, %arg2: memref<16x128xbf16, #tpu.memory_space<vmem>>, %arg3: memref<1x128xf32, #tpu.memory_space<vmem>>, %arg4: memref<128x128xbf16, #tpu.memory_space<vmem>>, %arg5: memref<1x128xf32, #tpu.memory_space<vmem>>, %arg6: memref<128x128xbf16, #tpu.memory_space<vmem>>, %arg7: memref<1x128xf32, #tpu.memory_space<vmem>>, %arg8: memref<128x128xf32, #tpu.memory_space<vmem>>) attributes {dimension_semantics = [#tpu.dimension_semantics<parallel>], iteration_bounds = array<i64: 2>, scalar_prefetch = 0 : i64, scratch_operands = 0 : i64, tpu.core_type = #tpu.core_type<tc>, window_params = [{transform_indices = @transform_0, window_bounds = array<i64: 128, 16>}, {pipeline_mode = #tpu.pipeline_mode<synchronous>, transform_indices = @transform_1, window_bounds = array<i64: 16, 128>}, {pipeline_mode = #tpu.pipeline_mode<synchronous>, transform_indices = @transform_2, window_bounds = array<i64: 1, 128>}, {pipeline_mode = #tpu.pipeline_mode<synchronous>, transform_indices = @transform_3, window_bounds = array<i64: 128, 128>}, {pipeline_mode = #tpu.pipeline_mode<synchronous>, transform_indices = @transform_4, window_bounds = array<i64: 1, 128>}, {pipeline_mode = #tpu.pipeline_mode<synchronous>, transform_indices = @transform_5, window_bounds = array<i64: 128, 128>}, {pipeline_mode = #tpu.pipeline_mode<synchronous>, transform_indices = @transform_6, window_bounds = array<i64: 1, 128>}, {transform_indices = @transform_7, window_bounds = array<i64: 128, 128>}]} {
    %c0 = arith.constant 0 : index
    %c0_0 = arith.constant 0 : index
    %0 = vector.load %arg1[%c0, %c0_0] : memref<128x16xf32, #tpu.memory_space<vmem>>, vector<128x16xf32>
    %1 = arith.truncf %0 : vector<128x16xf32> to vector<128x16xbf16>
    %c0_1 = arith.constant 0 : index
    %c0_2 = arith.constant 0 : index
    %2 = vector.load %arg2[%c0_1, %c0_2] : memref<16x128xbf16, #tpu.memory_space<vmem>>, vector<16x128xbf16>
    %cst = arith.constant dense<0.000000e+00> : vector<128x128xf32>
    %3 = tpu.matmul %1, %2, %cst {dimension_numbers = #tpu.dot_dimension_numbers<[1], [0], [0], [1], [0, 0, 1, 1], [], []>} : vector<128x16xbf16>, vector<16x128xbf16>, vector<128x128xf32> -> vector<128x128xf32>
    %c0_3 = arith.constant 0 : index
    %c0_4 = arith.constant 0 : index
    %4 = vector.load %arg3[%c0_3, %c0_4] : memref<1x128xf32, #tpu.memory_space<vmem>>, vector<1x128xf32>
    %5 = vector.broadcast %4 : vector<1x128xf32> to vector<128x128xf32>
    %6 = arith.addf %3, %5 : vector<128x128xf32>
    %cst_5 = arith.constant 0.000000e+00 : f32
    %7 = vector.broadcast %cst_5 : f32 to vector<128x128xf32>
    %8 = arith.maximumf %6, %7 : vector<128x128xf32>
    %9 = arith.truncf %8 : vector<128x128xf32> to vector<128x128xbf16>
    %c0_6 = arith.constant 0 : index
    %c0_7 = arith.constant 0 : index
    %10 = vector.load %arg4[%c0_6, %c0_7] : memref<128x128xbf16, #tpu.memory_space<vmem>>, vector<128x128xbf16>
    %cst_8 = arith.constant dense<0.000000e+00> : vector<128x128xf32>
    %11 = tpu.matmul %9, %10, %cst_8 {dimension_numbers = #tpu.dot_dimension_numbers<[1], [0], [0], [1], [0, 0, 1, 1], [], []>} : vector<128x128xbf16>, vector<128x128xbf16>, vector<128x128xf32> -> vector<128x128xf32>
    %c0_9 = arith.constant 0 : index
    %c0_10 = arith.constant 0 : index
    %12 = vector.load %arg5[%c0_9, %c0_10] : memref<1x128xf32, #tpu.memory_space<vmem>>, vector<1x128xf32>
    %13 = vector.broadcast %12 : vector<1x128xf32> to vector<128x128xf32>
    %14 = arith.addf %11, %13 : vector<128x128xf32>
    %cst_11 = arith.constant 0.000000e+00 : f32
    %15 = vector.broadcast %cst_11 : f32 to vector<128x128xf32>
    %16 = arith.maximumf %14, %15 : vector<128x128xf32>
    %17 = arith.truncf %16 : vector<128x128xf32> to vector<128x128xbf16>
    %c0_12 = arith.constant 0 : index
    %c0_13 = arith.constant 0 : index
    %18 = vector.load %arg6[%c0_12, %c0_13] : memref<128x128xbf16, #tpu.memory_space<vmem>>, vector<128x128xbf16>
    %cst_14 = arith.constant dense<0.000000e+00> : vector<128x128xf32>
    %19 = tpu.matmul %17, %18, %cst_14 {dimension_numbers = #tpu.dot_dimension_numbers<[1], [0], [0], [1], [0, 0, 1, 1], [], []>} : vector<128x128xbf16>, vector<128x128xbf16>, vector<128x128xf32> -> vector<128x128xf32>
    %c0_15 = arith.constant 0 : index
    %c0_16 = arith.constant 0 : index
    %20 = vector.load %arg7[%c0_15, %c0_16] : memref<1x128xf32, #tpu.memory_space<vmem>>, vector<1x128xf32>
    %21 = vector.broadcast %20 : vector<1x128xf32> to vector<128x128xf32>
    %22 = arith.addf %19, %21 : vector<128x128xf32>
    %c0_17 = arith.constant 0 : index
    %c0_18 = arith.constant 0 : index
    %23 = vector.load %arg8[%c0_17, %c0_18] : memref<128x128xf32, #tpu.memory_space<vmem>>, vector<128x128xf32>
    tpu.vector_store %arg8[%c0_17, %c0_18], %22 {strides = array<i32>} : memref<128x128xf32, #tpu.memory_space<vmem>>, vector<128x128xf32>,
    return
  }
  func.func @transform_0(%arg0: i32) -> (i32, i32) {
    %c0_i32 = arith.constant 0 : i32
    %c0_i32_0 = arith.constant 0 : i32
    return %arg0, %c0_i32 : i32, i32
  }
  func.func @transform_1(%arg0: i32) -> (i32, i32) {
    %c0_i32 = arith.constant 0 : i32
    %c0_i32_0 = arith.constant 0 : i32
    %c0_i32_1 = arith.constant 0 : i32
    return %c0_i32, %c0_i32_0 : i32, i32
  }
  func.func @transform_2(%arg0: i32) -> (i32, i32) {
    %c0_i32 = arith.constant 0 : i32
    %c0_i32_0 = arith.constant 0 : i32
    %c0_i32_1 = arith.constant 0 : i32
    return %c0_i32, %c0_i32_0 : i32, i32
  }
  func.func @transform_3(%arg0: i32) -> (i32, i32) {
    %c0_i32 = arith.constant 0 : i32
    %c0_i32_0 = arith.constant 0 : i32
    %c0_i32_1 = arith.constant 0 : i32
    return %c0_i32, %c0_i32_0 : i32, i32
  }
  func.func @transform_4(%arg0: i32) -> (i32, i32) {
    %c0_i32 = arith.constant 0 : i32
    %c0_i32_0 = arith.constant 0 : i32
    %c0_i32_1 = arith.constant 0 : i32
    return %c0_i32, %c0_i32_0 : i32, i32
  }
  func.func @transform_5(%arg0: i32) -> (i32, i32) {
    %c0_i32 = arith.constant 0 : i32
    %c0_i32_0 = arith.constant 0 : i32
    %c0_i32_1 = arith.constant 0 : i32
    return %c0_i32, %c0_i32_0 : i32, i32
  }
  func.func @transform_6(%arg0: i32) -> (i32, i32) {
    %c0_i32 = arith.constant 0 : i32
    %c0_i32_0 = arith.constant 0 : i32
    %c0_i32_1 = arith.constant 0 : i32
    return %c0_i32, %c0_i32_0 : i32, i32
  }
  func.func @transform_7(%arg0: i32) -> (i32, i32) {
    %c0_i32 = arith.constant 0 : i32
    %c0_i32_0 = arith.constant 0 : i32
    return %arg0, %c0_i32 : i32, i32
  }
}

</mosaic_0001>

<bundles_post_ra>
// kernel: _mlp_forward_impl.1
= control target key start
LH: loop header
LB: loop body
LE: loop exit
PB: predicated region body
PF: predicated region fallthrough
CT: control target
= control target key end

     0   :  { %s926_s24 = smov 0   ;;  %s1072_s0 = inlined_call_operand.vmem [shape: f32[256,16], index: 0, kind: input, shape index: {}]   ;;  %s1073_s1 = inlined_call_operand.vmem [shape: bf16[16,128], index: 1, kind: input, shape index: {}]   ;;  %s1074_s2 = inlined_call_operand.vmem [shape: f32[1,128], index: 2, kind: input, shape index: {}]   ;;  %s1075_s3 = inlined_call_operand.vmem [shape: bf16[128,128], index: 3, kind: input, shape index: {}]   ;;  %s1076_s4 = inlined_call_operand.vmem [shape: f32[1,128], index: 4, kind: input, shape index: {}]   ;;  %s1077_s5 = inlined_call_operand.vmem [shape: bf16[128,128], index: 5, kind: input, shape index: {}]   ;;  %s1078_s6 = inlined_call_operand.vmem [shape: f32[1,128], index: 6, kind: input, shape index: {}]   ;;  %s1079_s7 = inlined_call_operand.vmem [shape: f32[256,128], index: 7, kind: output, shape index: {}]  }
   0x1 LB: > { %s747_s25 = sadd.s32 4294967295, %s884_s24   ;;  %p751_p0 = scmp.ge.s32.totalorder %s884_s24, 1  ;;  %s884_s24 = sphi %s926_s24, %s17_s24  }
   0x2   : > { %p238_p1 = scmp.lt.s32.totalorder %s884_s24, 3 }
   0x4   : > { %p239_p2 = pnand %p751_p0, %p238_p1 }
   0x5   : > { %s752_s28 = sshll.u32 (!%p239_p2), %s747_s25, 4 }
   0x6   : > { %242 = sbr.rel (%p239_p2) target bundleno = 558 (0x22e), region = 48  ;;  %p271_p3 = scmp.lt.s32.totalorder (!%p239_p2), %s752_s28, 31 }
   0xb   : > { %v834_v0 = vld [vmem:[%s1073_s1] sm:$0xff]  ;;  %s1081_s28 = smov (!%p271_p3, %s752_s28), 31  ;;  %vm319_vm0 = vcmask 130048   ;;  %v842_v16 = vld [vmem:[%s1075_s3 + $0x38] sm:$0xff]  ;;  %v841_v20 = vld [vmem:[%s1075_s3 + $0x30] sm:$0xff] }
   0xc   : > { %351 = vmatpush.bf16.msra.mxu0 %v834_v0  ;;  %s753_s29 = sshll.u32 %s1081_s28, 3  ;;  %485 = vmatpush.bf16.msra.mxu1 %v842_v16  ;;  %v840_v21 = vld [vmem:[%s1075_s3 + $0x28] sm:$0xff]  ;;  %v839_v22 = vld [vmem:[%s1075_s3 + $0x20] sm:$0xff]  ;;  %v838_v25 = vld [vmem:[%s1075_s3 + $0x18] sm:$0xff] }
   0xd   : > { %s945_s9 = scalar_lea.vmem %s1072_s0, %s753_s29  ;;  %851 = vmatpush.bf16.msra.mxu3 %v842_v16  ;;  %v837_v27 = vld [vmem:[%s1075_s3 + $0x10] sm:$0xff]  ;;  %v836_v28 = vld [vmem:[%s1075_s3 + $0x8] sm:$0xff]  ;;  %v835_v29 = vld [vmem:[%s1075_s3] sm:$0xff]  ;;  %s1051_s10 = scalar_lea.vmem %s1079_s7, %s753_s29 }
   0xe   : > { %v283_v1 = vld [vmem:[%s945_s9] sm:$0xff]  ;;  %v284_v2 = vld [vmem:[%s945_s9 + $0x8] sm:$0xff]  ;;  %v285_v4 = vld [vmem:[%s945_s9 + $0x10] sm:$0xff] }
   0xf   : > { %v299_v3 = vpack.c.bf16 %v284_v2, %v283_v1  ;;  %v286_v5 = vld [vmem:[%s945_s9 + $0x18] sm:$0xff]  ;;  %v287_v7 = vld [vmem:[%s945_s9 + $0x20] sm:$0xff]  ;;  %v288_v8 = vld [vmem:[%s945_s9 + $0x28] sm:$0xff] }
  0x10   : > { %v300_v6 = vpack.c.bf16 %v286_v5, %v285_v4  ;;  %v301_v9 = vpack.c.bf16 %v288_v8, %v287_v7  ;;  %v289_v10 = vld [vmem:[%s945_s9 + $0x30] sm:$0xff]  ;;  %v290_v11 = vld [vmem:[%s945_s9 + $0x38] sm:$0xff]  ;;  %v291_v13 = vld [vmem:[%s945_s9 + $0x40] sm:$0xff]  ;;  %486 = vmatpush.bf16.msra.mxu1 %v841_v20 }
  0x11   : > { %760 = vmatmul.msk.bf16.vlgmr.msra.gmra.mxu0 %vm319_vm0, %v299_v3  ;;  %v302_v12 = vpack.c.bf16 %v290_v11, %v289_v10  ;;  %v292_v14 = vld [vmem:[%s945_s9 + $0x48] sm:$0xff]  ;;  %v293_v17 = vld [vmem:[%s945_s9 + $0x50] sm:$0xff]  ;;  %v294_v18 = vld [vmem:[%s945_s9 + $0x58] sm:$0xff]  ;;  %852 = vmatpush.bf16.msra.mxu3 %v841_v20 }
  0x12   : > { %v303_v15 = vpack.c.bf16 %v292_v14, %v291_v13  ;;  %v304_v19 = vpack.c.bf16 %v294_v18, %v293_v17  ;;  %v295_v23 = vld [vmem:[%s945_s9 + $0x60] sm:$0xff]  ;;  %v296_v24 = vld [vmem:[%s945_s9 + $0x68] sm:$0xff]  ;;  %v297_v30 = vld [vmem:[%s945_s9 + $0x70] sm:$0xff] }
  0x13   : > { %v305_v26 = vpack.c.bf16 %v296_v24, %v295_v23  ;;  %v298_v31 = vld [vmem:[%s945_s9 + $0x78] sm:$0xff]  ;;  %v998_v34 = vld [vmem:[%s1074_s2] ss:$0 sm:$0xff]  ;;  %v849_v13 = vld [vmem:[%s1077_s5 + $0x30] sm:$0xff] }
  0x14   : > { %487 = vmatpush.bf16.msra.mxu1 %v840_v21  ;;  %v306_v32 = vpack.c.bf16 %v298_v31, %v297_v30  ;;  %v847_v16 = vld [vmem:[%s1077_s5 + $0x20] sm:$0xff]  ;;  %v846_v20 = vld [vmem:[%s1077_s5 + $0x18] sm:$0xff]  ;;  %v845_v24 = vld [vmem:[%s1077_s5 + $0x10] sm:$0xff] }
  0x15   : > { %853 = vmatpush.bf16.msra.mxu3 %v840_v21 }
  0x18   : > { %488 = vmatpush.bf16.msra.mxu1 %v839_v22 }
  0x19   : > { %854 = vmatpush.bf16.msra.mxu3 %v839_v22 }
  0x1c   : > { %489 = vmatpush.bf16.msra.mxu1 %v838_v25 }
  0x1d   : > { %855 = vmatpush.bf16.msra.mxu3 %v838_v25 }
  0x20   : > { %490 = vmatpush.bf16.msra.mxu1 %v837_v27 }
  0x21   : > { %761 = vmatmul.msk.bf16.gmra.mxu0 %vm319_vm0, %v300_v6  ;;  %856 = vmatpush.bf16.msra.mxu3 %v837_v27  ;;  %v843_v27 = vld [vmem:[%s1077_s5] sm:$0xff] }
  0x24   : > { %491 = vmatpush.bf16.msra.mxu1 %v836_v28 }
  0x25   : > { %857 = vmatpush.bf16.msra.mxu3 %v836_v28 }
  0x28   : > { %492 = vmatpush.bf16.msra.mxu1 %v835_v29 }
  0x29   : > { %858 = vmatpush.bf16.msra.mxu3 %v835_v29 }
  0x31   : > { %762 = vmatmul.msk.bf16.gmra.mxu0 %vm319_vm0, %v301_v9  ;;  %v850_v9 = vld [vmem:[%s1077_s5 + $0x38] sm:$0xff] }
  0x32   : > { %626 = vmatpush.bf16.msra.mxu2 %v850_v9  ;;  %859 = vmatpush.bf16.msrb.mxu3 %v850_v9 }
  0x36   : > { %627 = vmatpush.bf16.msra.mxu2 %v849_v13  ;;  %860 = vmatpush.bf16.msrb.mxu3 %v849_v13 }
  0x41   : > { %763 = vmatmul.msk.bf16.gmra.mxu0 %vm319_vm0, %v302_v12 }
  0x51   : > { %764 = vmatmul.msk.bf16.gmra.mxu0 %vm319_vm0, %v303_v15  ;;  %v848_v15 = vld [vmem:[%s1077_s5 + $0x28] sm:$0xff] }
  0x52   : > { %628 = vmatpush.bf16.msra.mxu2 %v848_v15  ;;  %861 = vmatpush.bf16.msrb.mxu3 %v848_v15 }
  0x56   : > { %629 = vmatpush.bf16.msra.mxu2 %v847_v16  ;;  %862 = vmatpush.bf16.msrb.mxu3 %v847_v16 }
  0x5a   : > { %630 = vmatpush.bf16.msra.mxu2 %v846_v20  ;;  %863 = vmatpush.bf16.msrb.mxu3 %v846_v20 }
  0x5e   : > { %631 = vmatpush.bf16.msra.mxu2 %v845_v24  ;;  %864 = vmatpush.bf16.msrb.mxu3 %v845_v24 }
  0x61   : > { %765 = vmatmul.msk.bf16.gmra.mxu0 %vm319_vm0, %v304_v19 }
  0x71   : > { %766 = vmatmul.msk.bf16.gmra.mxu0 %vm319_vm0, %v305_v26  ;;  %v844_v26 = vld [vmem:[%s1077_s5 + $0x8] sm:$0xff] }
  0x72   : > { %632 = vmatpush.bf16.msra.mxu2 %v844_v26  ;;  %865 = vmatpush.bf16.msrb.mxu3 %v844_v26 }
  0x76   : > { %633 = vmatpush.bf16.msra.mxu2 %v843_v27  ;;  %866 = vmatpush.bf16.msrb.mxu3 %v843_v27  ;;  %v877_v27 = vld [vmem:[%s1078_s6] ss:$0 sm:$0xff] }
  0x81   : > { %767 = vmatmul.msk.bf16.gmra.mxu0 %vm319_vm0, %v306_v32 }
  0x8e   : > { %v353_v33 = vpop.f32.mrf.mxu0 }
  0x8f   : > { %v354_v35 = vadd.f32 %v998_v34, %v353_v33 }
  0x91   : > { %v393_v38 = vmax.f32 %v354_v35, 0.0 }
  0x96   : > { %v355_v36 = vpop.f32.mrf.mxu0 }
  0x97   : > { %v356_v37 = vadd.f32 %v998_v34, %v355_v36  ;;  %v876_v36 = vld [vmem:[%s1076_s4] ss:$0 sm:$0xff] }
  0x99   : > { %v394_v39 = vmax.f32 %v356_v37, 0.0 }
  0x9b   : > { %v409_v40 = vpack.c.bf16 %v394_v39, %v393_v38 }
  0x9d   : > { %493 = vmatmul.bf16.vlgmr.msra.gmra.mxu1 %v409_v40 }
  0x9e   : > { %v358_v41 = vpop.f32.mrf.mxu0 }
  0x9f   : > { %v359_v42 = vadd.f32 %v998_v34, %v358_v41 }
  0xa1   : > { %v395_v45 = vmax.f32 %v359_v42, 0.0 }
  0xa6   : > { %v360_v43 = vpop.f32.mrf.mxu0 }
  0xa7   : > { %v361_v44 = vadd.f32 %v998_v34, %v360_v43 }
  0xa9   : > { %v396_v46 = vmax.f32 %v361_v44, 0.0 }
  0xab   : > { %v410_v47 = vpack.c.bf16 %v396_v46, %v395_v45 }
  0xad   : > { %498 = vmatmul.bf16.gmra.mxu1 %v410_v47 }
  0xae   : > { %v363_v48 = vpop.f32.mrf.mxu0 }
  0xaf   : > { %v364_v49 = vadd.f32 %v998_v34, %v363_v48 }
  0xb1   : > { %v397_v52 = vmax.f32 %v364_v49, 0.0 }
  0xb6   : > { %v365_v50 = vpop.f32.mrf.mxu0 }
  0xb7   : > { %v366_v51 = vadd.f32 %v998_v34, %v365_v50 }
  0xb9   : > { %v398_v53 = vmax.f32 %v366_v51, 0.0 }
  0xbb   : > { %v411_v54 = vpack.c.bf16 %v398_v53, %v397_v52 }
  0xbd   : > { %503 = vmatmul.bf16.gmra.mxu1 %v411_v54 }
  0xbe   : > { %v368_v55 = vpop.f32.mrf.mxu0 }
  0xbf   : > { %v369_v56 = vadd.f32 %v998_v34, %v368_v55 }
  0xc1   : > { %v399_v59 = vmax.f32 %v369_v56, 0.0 }
  0xc6   : > { %v370_v57 = vpop.f32.mrf.mxu0 }
  0xc7   : > { %v371_v58 = vadd.f32 %v998_v34, %v370_v57 }
  0xc9   : > { %v400_v60 = vmax.f32 %v371_v58, 0.0 }
  0xcb   : > { %v412_v61 = vpack.c.bf16 %v400_v60, %v399_v59 }
  0xcd   : > { %508 = vmatmul.bf16.gmra.mxu1 %v412_v61 }
  0xce   : > { %v373_v62 = vpop.f32.mrf.mxu0 }
  0xcf   : > { %v374_v63 = vadd.f32 %v998_v34, %v373_v62 }
  0xd1   : > { %v401_v2 = vmax.f32 %v374_v63, 0.0 }
  0xd6   : > { %v375_v0 = vpop.f32.mrf.mxu0 }
  0xd7   : > { %v376_v1 = vadd.f32 %v998_v34, %v375_v0 }
  0xd9   : > { %v402_v3 = vmax.f32 %v376_v1, 0.0 }
  0xdb   : > { %v413_v4 = vpack.c.bf16 %v402_v3, %v401_v2 }
  0xdd   : > { %513 = vmatmul.bf16.gmra.mxu1 %v413_v4 }
  0xde   : > { %v378_v5 = vpop.f32.mrf.mxu0 }
  0xdf   : > { %v379_v6 = vadd.f32 %v998_v34, %v378_v5 }
  0xe1   : > { %v403_v10 = vmax.f32 %v379_v6, 0.0 }
  0xe6   : > { %v380_v7 = vpop.f32.mrf.mxu0 }
  0xe7   : > { %v381_v8 = vadd.f32 %v998_v34, %v380_v7 }
  0xe9   : > { %v404_v11 = vmax.f32 %v381_v8, 0.0 }
  0xeb   : > { %v414_v12 = vpack.c.bf16 %v404_v11, %v403_v10 }
  0xed   : > { %518 = vmatmul.bf16.gmra.mxu1 %v414_v12 }
  0xee   : > { %v383_v14 = vpop.f32.mrf.mxu0 }
  0xef   : > { %v384_v17 = vadd.f32 %v998_v34, %v383_v14 }
  0xf1   : > { %v405_v21 = vmax.f32 %v384_v17, 0.0 }
  0xf6   : > { %v385_v18 = vpop.f32.mrf.mxu0 }
  0xf7   : > { %v386_v19 = vadd.f32 %v998_v34, %v385_v18 }
  0xf9   : > { %v406_v22 = vmax.f32 %v386_v19, 0.0 }
  0xfb   : > { %v415_v23 = vpack.c.bf16 %v406_v22, %v405_v21 }
  0xfd   : > { %523 = vmatmul.bf16.vlgmr.msra.gmra.mxu3 %v415_v23 }
  0xfe   : > { %v388_v25 = vpop.f32.mrf.mxu0 }
  0xff   : > { %v389_v28 = vadd.f32 %v998_v34, %v388_v25 }
 0x101   : > { %v407_v31 = vmax.f32 %v389_v28, 0.0 }
 0x106   : > { %v390_v29 = vpop.f32.mrf.mxu0 }
 0x107   : > { %v391_v30 = vadd.f32 %v998_v34, %v390_v29 }
 0x109   : > { %v408_v32 = vmax.f32 %v391_v30, 0.0 }
 0x10b   : > { %v416_v33 = vpack.c.bf16 %v408_v32, %v407_v31 }
 0x10d   : > { %528 = vmatmul.bf16.gmra.mxu3 %v416_v33 }
 0x11a   : > { %v494_v35 = vpop.f32.mrf.mxu1 }
 0x11b   : > { %v495_v37 = vadd.f32 %v876_v36, %v494_v35 }
 0x11d   : > { %v534_v40 = vmax.f32 %v495_v37, 0.0 }
 0x122   : > { %v496_v38 = vpop.f32.mrf.mxu1 }
 0x123   : > { %v497_v39 = vadd.f32 %v876_v36, %v496_v38 }
 0x125   : > { %v535_v41 = vmax.f32 %v497_v39, 0.0 }
 0x127   : > { %v550_v42 = vpack.c.bf16 %v535_v41, %v534_v40 }
 0x129   : > { %634 = vmatmul.bf16.vlgmr.msra.gmra.mxu2 %v550_v42 }
 0x12a   : > { %v499_v43 = vpop.f32.mrf.mxu1 }
 0x12b   : > { %v500_v44 = vadd.f32 %v876_v36, %v499_v43 }
 0x12d   : > { %v536_v46 = vmax.f32 %v500_v44, 0.0 }
 0x132   : > { %v501_v45 = vpop.f32.mrf.mxu1 }
 0x133   : > { %v502_v34 = vadd.f32 %v876_v36, %v501_v45 }
 0x135   : > { %v537_v47 = vmax.f32 %v502_v34, 0.0 }
 0x137   : > { %v551_v48 = vpack.c.bf16 %v537_v47, %v536_v46 }
 0x139   : > { %639 = vmatmul.bf16.gmra.mxu2 %v551_v48 }
 0x13a   : > { %v504_v49 = vpop.f32.mrf.mxu1 }
 0x13b   : > { %v505_v50 = vadd.f32 %v876_v36, %v504_v49 }
 0x13d   : > { %v538_v53 = vmax.f32 %v505_v50, 0.0 }
 0x142   : > { %v506_v51 = vpop.f32.mrf.mxu1 }
 0x143   : > { %v507_v52 = vadd.f32 %v876_v36, %v506_v51 }
 0x145   : > { %v539_v54 = vmax.f32 %v507_v52, 0.0 }
 0x147   : > { %v552_v55 = vpack.c.bf16 %v539_v54, %v538_v53 }
 0x149   : > { %644 = vmatmul.bf16.gmra.mxu2 %v552_v55 }
 0x14a   : > { %v509_v56 = vpop.f32.mrf.mxu1 }
 0x14b   : > { %v510_v57 = vadd.f32 %v876_v36, %v509_v56 }
 0x14d   : > { %v540_v60 = vmax.f32 %v510_v57, 0.0 }
 0x152   : > { %v511_v58 = vpop.f32.mrf.mxu1 }
 0x153   : > { %v512_v59 = vadd.f32 %v876_v36, %v511_v58 }
 0x155   : > { %v541_v61 = vmax.f32 %v512_v59, 0.0 }
 0x157   : > { %v553_v62 = vpack.c.bf16 %v541_v61, %v540_v60 }
 0x159   : > { %649 = vmatmul.bf16.gmra.mxu2 %v553_v62 }
 0x15a   : > { %v514_v63 = vpop.f32.mrf.mxu1 }
 0x15b   : > { %v515_v0 = vadd.f32 %v876_v36, %v514_v63 }
 0x15d   : > { %v542_v3 = vmax.f32 %v515_v0, 0.0 }
 0x162   : > { %v516_v1 = vpop.f32.mrf.mxu1 }
 0x163   : > { %v517_v2 = vadd.f32 %v876_v36, %v516_v1 }
 0x165   : > { %v543_v4 = vmax.f32 %v517_v2, 0.0 }
 0x167   : > { %v554_v5 = vpack.c.bf16 %v543_v4, %v542_v3 }
 0x169   : > { %654 = vmatmul.bf16.gmra.mxu2 %v554_v5 }
 0x16a   : > { %v519_v6 = vpop.f32.mrf.mxu1 }
 0x16b   : > { %v520_v7 = vadd.f32 %v876_v36, %v519_v6 }
 0x16d   : > { %v544_v10 = vmax.f32 %v520_v7, 0.0 }
 0x172   : > { %v521_v8 = vpop.f32.mrf.mxu1 }
 0x173   : > { %v522_v9 = vadd.f32 %v876_v36, %v521_v8 }
 0x175   : > { %v545_v11 = vmax.f32 %v522_v9, 0.0 }
 0x177   : > { %v555_v12 = vpack.c.bf16 %v545_v11, %v544_v10 }
 0x179   : > { %659 = vmatmul.bf16.gmra.mxu2 %v555_v12 }
 0x180   : > { %v524_v13 = vpop.f32.mrf.mxu3 }
 0x181   : > { %v525_v14 = vadd.f32 %v876_v36, %v524_v13 }
 0x183   : > { %v546_v17 = vmax.f32 %v525_v14, 0.0 }
 0x188   : > { %v526_v15 = vpop.f32.mrf.mxu3 }
 0x189   : > { %v527_v16 = vadd.f32 %v876_v36, %v526_v15 }
 0x18b   : > { %v547_v18 = vmax.f32 %v527_v16, 0.0 }
 0x18d   : > { %v556_v19 = vpack.c.bf16 %v547_v18, %v546_v17 }
 0x18f   : > { %664 = vmatmul.bf16.vlgmr.msrb.gmra.mxu3 %v556_v19 }
 0x190   : > { %v529_v20 = vpop.f32.mrf.mxu3 }
 0x191   : > { %v530_v21 = vadd.f32 %v876_v36, %v529_v20 }
 0x193   : > { %v548_v24 = vmax.f32 %v530_v21, 0.0 }
 0x198   : > { %v531_v22 = vpop.f32.mrf.mxu3 }
 0x199   : > { %v532_v23 = vadd.f32 %v876_v36, %v531_v22 }
 0x19b   : > { %v549_v25 = vmax.f32 %v532_v23, 0.0 }
 0x19d   : > { %v557_v26 = vpack.c.bf16 %v549_v25, %v548_v24 }
 0x19f   : > { %669 = vmatmul.bf16.gmra.mxu3 %v557_v26 }
 0x1ac   : > { %v635_v28 = vpop.f32.mrf.mxu2 }
 0x1ad   : > { %v636_v29 = vadd.f32 %v877_v27, %v635_v28 }
 0x1af   : > { %675 = vst [vmem:[%s1051_s10] sm:$0xff] %v636_v29 }
 0x1b4   : > { %v637_v30 = vpop.f32.mrf.mxu2 }
 0x1b5   : > { %v638_v31 = vadd.f32 %v877_v27, %v637_v30 }
 0x1b7   : > { %676 = vst [vmem:[%s1051_s10 + $0x8] sm:$0xff] %v638_v31 }
 0x1bc   : > { %v640_v32 = vpop.f32.mrf.mxu2 }
 0x1bd   : > { %v641_v33 = vadd.f32 %v877_v27, %v640_v32 }
 0x1bf   : > { %677 = vst [vmem:[%s1051_s10 + $0x10] sm:$0xff] %v641_v33 }
 0x1c4   : > { %v642_v35 = vpop.f32.mrf.mxu2 }
 0x1c5   : > { %v643_v36 = vadd.f32 %v877_v27, %v642_v35 }
 0x1c7   : > { %678 = vst [vmem:[%s1051_s10 + $0x18] sm:$0xff] %v643_v36 }
 0x1cc   : > { %v645_v37 = vpop.f32.mrf.mxu2 }
 0x1cd   : > { %v646_v38 = vadd.f32 %v877_v27, %v645_v37 }
 0x1cf   : > { %679 = vst [vmem:[%s1051_s10 + $0x20] sm:$0xff] %v646_v38 }
 0x1d4   : > { %v647_v39 = vpop.f32.mrf.mxu2 }
 0x1d5   : > { %v648_v40 = vadd.f32 %v877_v27, %v647_v39 }
 0x1d7   : > { %680 = vst [vmem:[%s1051_s10 + $0x28] sm:$0xff] %v648_v40 }
 0x1dc   : > { %v650_v41 = vpop.f32.mrf.mxu2 }
 0x1dd   : > { %v651_v42 = vadd.f32 %v877_v27, %v650_v41 }
 0x1df   : > { %681 = vst [vmem:[%s1051_s10 + $0x30] sm:$0xff] %v651_v42 }
 0x1e4   : > { %v652_v43 = vpop.f32.mrf.mxu2 }
 0x1e5   : > { %v653_v44 = vadd.f32 %v877_v27, %v652_v43 }
 0x1e7   : > { %682 = vst [vmem:[%s1051_s10 + $0x38] sm:$0xff] %v653_v44 }
 0x1ec   : > { %v655_v45 = vpop.f32.mrf.mxu2 }
 0x1ed   : > { %v656_v34 = vadd.f32 %v877_v27, %v655_v45 }
 0x1ef   : > { %683 = vst [vmem:[%s1051_s10 + $0x40] sm:$0xff] %v656_v34 }
 0x1f4   : > { %v657_v46 = vpop.f32.mrf.mxu2 }
 0x1f5   : > { %v658_v47 = vadd.f32 %v877_v27, %v657_v46 }
 0x1f7   : > { %684 = vst [vmem:[%s1051_s10 + $0x48] sm:$0xff] %v658_v47 }
 0x1fc   : > { %v660_v48 = vpop.f32.mrf.mxu2 }
 0x1fd   : > { %v661_v49 = vadd.f32 %v877_v27, %v660_v48 }
 0x1ff   : > { %685 = vst [vmem:[%s1051_s10 + $0x50] sm:$0xff] %v661_v49 }
 0x204   : > { %v662_v50 = vpop.f32.mrf.mxu2 }
 0x205   : > { %v663_v51 = vadd.f32 %v877_v27, %v662_v50 }
 0x207   : > { %686 = vst [vmem:[%s1051_s10 + $0x58] sm:$0xff] %v663_v51 }
 0x212   : > { %v665_v52 = vpop.f32.mrf.mxu3 }
 0x213   : > { %v666_v53 = vadd.f32 %v877_v27, %v665_v52 }
 0x215   : > { %687 = vst [vmem:[%s1051_s10 + $0x60] sm:$0xff] %v666_v53 }
 0x21a   : > { %v667_v54 = vpop.f32.mrf.mxu3 }
 0x21b   : > { %v668_v55 = vadd.f32 %v877_v27, %v667_v54 }
 0x21d   : > { %688 = vst [vmem:[%s1051_s10 + $0x68] sm:$0xff] %v668_v55 }
 0x222   : > { %v670_v56 = vpop.f32.mrf.mxu3 }
 0x223   : > { %v671_v57 = vadd.f32 %v877_v27, %v670_v56 }
 0x225   : > { %689 = vst [vmem:[%s1051_s10 + $0x70] sm:$0xff] %v671_v57 }
 0x22a   : > { %v672_v58 = vpop.f32.mrf.mxu3 }
 0x22b   : > { %v673_v59 = vadd.f32 %v877_v27, %v672_v58 }
 0x22d   : > { %690 = vst [vmem:[%s1051_s10 + $0x78] sm:$0xff] %v673_v59 }
 0x22e PF: > { %s17_s24 = sadd.s32 1, %s884_s24  }
 0x22f   : > { %p14_p4 = scmp.ge.s32.totalorder %s17_s24, 4  }
 0x231   :  { %16 = sbr.rel (!%p14_p4) target bundleno = 1 (0x1), region = 78 }

// kernel: _mlp_forward_impl.1
= control target key start
LH: loop header
LB: loop body
LE: loop exit
PB: predicated region body
PF: predicated region fallthrough
CT: control target
= control target key end

     0   :  { %s926_s24 = smov 0   ;;  %s1072_s0 = inlined_call_operand.vmem [shape: f32[256,16], index: 0, kind: input, shape index: {}]   ;;  %s1073_s1 = inlined_call_operand.vmem [shape: bf16[16,128], index: 1, kind: input, shape index: {}]   ;;  %s1074_s2 = inlined_call_operand.vmem [shape: f32[1,128], index: 2, kind: input, shape index: {}]   ;;  %s1075_s3 = inlined_call_operand.vmem [shape: bf16[128,128], index: 3, kind: input, shape index: {}]   ;;  %s1076_s4 = inlined_call_operand.vmem [shape: f32[1,128], index: 4, kind: input, shape index: {}]   ;;  %s1077_s5 = inlined_call_operand.vmem [shape: bf16[128,128], index: 5, kind: input, shape index: {}]   ;;  %s1078_s6 = inlined_call_operand.vmem [shape: f32[1,128], index: 6, kind: input, shape index: {}]   ;;  %s1079_s7 = inlined_call_operand.vmem [shape: f32[256,128], index: 7, kind: output, shape index: {}]  }
   0x1 LB: > { %s747_s25 = sadd.s32 4294967295, %s884_s24   ;;  %p751_p0 = scmp.ge.s32.totalorder %s884_s24, 1  ;;  %s884_s24 = sphi %s926_s24, %s17_s24  }
   0x2   : > { %p238_p1 = scmp.lt.s32.totalorder %s884_s24, 3 }
   0x4   : > { %p239_p2 = pnand %p751_p0, %p238_p1 }
   0x5   : > { %s752_s28 = sshll.u32 (!%p239_p2), %s747_s25, 4 }
   0x6   : > { %242 = sbr.rel (%p239_p2) target bundleno = 558 (0x22e), region = 48  ;;  %p271_p3 = scmp.lt.s32.totalorder (!%p239_p2), %s752_s28, 31 }
   0xb   : > { %v834_v0 = vld [vmem:[%s1073_s1] sm:$0xff]  ;;  %s1081_s28 = smov (!%p271_p3, %s752_s28), 31  ;;  %vm319_vm0 = vcmask 130048   ;;  %v842_v16 = vld [vmem:[%s1075_s3 + $0x38] sm:$0xff]  ;;  %v841_v20 = vld [vmem:[%s1075_s3 + $0x30] sm:$0xff] }
   0xc   : > { %351 = vmatpush.bf16.msra.mxu0 %v834_v0  ;;  %s753_s29 = sshll.u32 %s1081_s28, 3  ;;  %485 = vmatpush.bf16.msra.mxu1 %v842_v16  ;;  %v840_v21 = vld [vmem:[%s1075_s3 + $0x28] sm:$0xff]  ;;  %v839_v22 = vld [vmem:[%s1075_s3 + $0x20] sm:$0xff]  ;;  %v838_v25 = vld [vmem:[%s1075_s3 + $0x18] sm:$0xff] }
   0xd   : > { %s945_s9 = scalar_lea.vmem %s1072_s0, %s753_s29  ;;  %851 = vmatpush.bf16.msra.mxu3 %v842_v16  ;;  %v837_v27 = vld [vmem:[%s1075_s3 + $0x10] sm:$0xff]  ;;  %v836_v28 = vld [vmem:[%s1075_s3 + $0x8] sm:$0xff]  ;;  %v835_v29 = vld [vmem:[%s1075_s3] sm:$0xff]  ;;  %s1051_s10 = scalar_lea.vmem %s1079_s7, %s753_s29 }
   0xe   : > { %v283_v1 = vld [vmem:[%s945_s9] sm:$0xff]  ;;  %v284_v2 = vld [vmem:[%s945_s9 + $0x8] sm:$0xff]  ;;  %v285_v4 = vld [vmem:[%s945_s9 + $0x10] sm:$0xff] }
   0xf   : > { %v299_v3 = vpack.c.bf16 %v284_v2, %v283_v1  ;;  %v286_v5 = vld [vmem:[%s945_s9 + $0x18] sm:$0xff]  ;;  %v287_v7 = vld [vmem:[%s945_s9 + $0x20] sm:$0xff]  ;;  %v288_v8 = vld [vmem:[%s945_s9 + $0x28] sm:$0xff] }
  0x10   : > { %v300_v6 = vpack.c.bf16 %v286_v5, %v285_v4  ;;  %v301_v9 = vpack.c.bf16 %v288_v8, %v287_v7  ;;  %v289_v10 = vld [vmem:[%s945_s9 + $0x30] sm:$0xff]  ;;  %v290_v11 = vld [vmem:[%s945_s9 + $0x38] sm:$0xff]  ;;  %v291_v13 = vld [vmem:[%s945_s9 + $0x40] sm:$0xff]  ;;  %486 = vmatpush.bf16.msra.mxu1 %v841_v20 }
  0x11   : > { %760 = vmatmul.msk.bf16.vlgmr.msra.gmra.mxu0 %vm319_vm0, %v299_v3  ;;  %v302_v12 = vpack.c.bf16 %v290_v11, %v289_v10  ;;  %v292_v14 = vld [vmem:[%s945_s9 + $0x48] sm:$0xff]  ;;  %v293_v17 = vld [vmem:[%s945_s9 + $0x50] sm:$0xff]  ;;  %v294_v18 = vld [vmem:[%s945_s9 + $0x58] sm:$0xff]  ;;  %852 = vmatpush.bf16.msra.mxu3 %v841_v20 }
  0x12   : > { %v303_v15 = vpack.c.bf16 %v292_v14, %v291_v13  ;;  %v304_v19 = vpack.c.bf16 %v294_v18, %v293_v17  ;;  %v295_v23 = vld [vmem:[%s945_s9 + $0x60] sm:$0xff]  ;;  %v296_v24 = vld [vmem:[%s945_s9 + $0x68] sm:$0xff]  ;;  %v297_v30 = vld [vmem:[%s945_s9 + $0x70] sm:$0xff] }
  0x13   : > { %v305_v26 = vpack.c.bf16 %v296_v24, %v295_v23  ;;  %v298_v31 = vld [vmem:[%s945_s9 + $0x78] sm:$0xff]  ;;  %v998_v34 = vld [vmem:[%s1074_s2] ss:$0 sm:$0xff]  ;;  %v849_v13 = vld [vmem:[%s1077_s5 + $0x30] sm:$0xff] }
  0x14   : > { %487 = vmatpush.bf16.msra.mxu1 %v840_v21  ;;  %v306_v32 = vpack.c.bf16 %v298_v31, %v297_v30  ;;  %v847_v16 = vld [vmem:[%s1077_s5 + $0x20] sm:$0xff]  ;;  %v846_v20 = vld [vmem:[%s1077_s5 + $0x18] sm:$0xff]  ;;  %v845_v24 = vld [vmem:[%s1077_s5 + $0x10] sm:$0xff] }
  0x15   : > { %853 = vmatpush.bf16.msra.mxu3 %v840_v21 }
  0x18   : > { %488 = vmatpush.bf16.msra.mxu1 %v839_v22 }
  0x19   : > { %854 = vmatpush.bf16.msra.mxu3 %v839_v22 }
  0x1c   : > { %489 = vmatpush.bf16.msra.mxu1 %v838_v25 }
  0x1d   : > { %855 = vmatpush.bf16.msra.mxu3 %v838_v25 }
  0x20   : > { %490 = vmatpush.bf16.msra.mxu1 %v837_v27 }
  0x21   : > { %761 = vmatmul.msk.bf16.gmra.mxu0 %vm319_vm0, %v300_v6  ;;  %856 = vmatpush.bf16.msra.mxu3 %v837_v27  ;;  %v843_v27 = vld [vmem:[%s1077_s5] sm:$0xff] }
  0x24   : > { %491 = vmatpush.bf16.msra.mxu1 %v836_v28 }
  0x25   : > { %857 = vmatpush.bf16.msra.mxu3 %v836_v28 }
  0x28   : > { %492 = vmatpush.bf16.msra.mxu1 %v835_v29 }
  0x29   : > { %858 = vmatpush.bf16.msra.mxu3 %v835_v29 }
  0x31   : > { %762 = vmatmul.msk.bf16.gmra.mxu0 %vm319_vm0, %v301_v9  ;;  %v850_v9 = vld [vmem:[%s1077_s5 + $0x38] sm:$0xff] }
  0x32   : > { %626 = vmatpush.bf16.msra.mxu2 %v850_v9  ;;  %859 = vmatpush.bf16.msrb.mxu3 %v850_v9 }
  0x36   : > { %627 = vmatpush.bf16.msra.mxu2 %v849_v13  ;;  %860 = vmatpush.bf16.msrb.mxu3 %v849_v13 }
  0x41   : > { %763 = vmatmul.msk.bf16.gmra.mxu0 %vm319_vm0, %v302_v12 }
  0x51   : > { %764 = vmatmul.msk.bf16.gmra.mxu0 %vm319_vm0, %v303_v15  ;;  %v848_v15 = vld [vmem:[%s1077_s5 + $0x28] sm:$0xff] }
  0x52   : > { %628 = vmatpush.bf16.msra.mxu2 %v848_v15  ;;  %861 = vmatpush.bf16.msrb.mxu3 %v848_v15 }
  0x56   : > { %629 = vmatpush.bf16.msra.mxu2 %v847_v16  ;;  %862 = vmatpush.bf16.msrb.mxu3 %v847_v16 }
  0x5a   : > { %630 = vmatpush.bf16.msra.mxu2 %v846_v20  ;;  %863 = vmatpush.bf16.msrb.mxu3 %v846_v20 }
  0x5e   : > { %631 = vmatpush.bf16.msra.mxu2 %v845_v24  ;;  %864 = vmatpush.bf16.msrb.mxu3 %v845_v24 }
  0x61   : > { %765 = vmatmul.msk.bf16.gmra.mxu0 %vm319_vm0, %v304_v19 }
  0x71   : > { %766 = vmatmul.msk.bf16.gmra.mxu0 %vm319_vm0, %v305_v26  ;;  %v844_v26 = vld [vmem:[%s1077_s5 + $0x8] sm:$0xff] }
  0x72   : > { %632 = vmatpush.bf16.msra.mxu2 %v844_v26  ;;  %865 = vmatpush.bf16.msrb.mxu3 %v844_v26 }
  0x76   : > { %633 = vmatpush.bf16.msra.mxu2 %v843_v27  ;;  %866 = vmatpush.bf16.msrb.mxu3 %v843_v27  ;;  %v877_v27 = vld [vmem:[%s1078_s6] ss:$0 sm:$0xff] }
  0x81   : > { %767 = vmatmul.msk.bf16.gmra.mxu0 %vm319_vm0, %v306_v32 }
  0x8e   : > { %v353_v33 = vpop.f32.mrf.mxu0 }
  0x8f   : > { %v354_v35 = vadd.f32 %v998_v34, %v353_v33 }
  0x91   : > { %v393_v38 = vmax.f32 %v354_v35, 0.0 }
  0x96   : > { %v355_v36 = vpop.f32.mrf.mxu0 }
  0x97   : > { %v356_v37 = vadd.f32 %v998_v34, %v355_v36  ;;  %v876_v36 = vld [vmem:[%s1076_s4] ss:$0 sm:$0xff] }
  0x99   : > { %v394_v39 = vmax.f32 %v356_v37, 0.0 }
  0x9b   : > { %v409_v40 = vpack.c.bf16 %v394_v39, %v393_v38 }
  0x9d   : > { %493 = vmatmul.bf16.vlgmr.msra.gmra.mxu1 %v409_v40 }
  0x9e   : > { %v358_v41 = vpop.f32.mrf.mxu0 }
  0x9f   : > { %v359_v42 = vadd.f32 %v998_v34, %v358_v41 }
  0xa1   : > { %v395_v45 = vmax.f32 %v359_v42, 0.0 }
  0xa6   : > { %v360_v43 = vpop.f32.mrf.mxu0 }
  0xa7   : > { %v361_v44 = vadd.f32 %v998_v34, %v360_v43 }
  0xa9   : > { %v396_v46 = vmax.f32 %v361_v44, 0.0 }
  0xab   : > { %v410_v47 = vpack.c.bf16 %v396_v46, %v395_v45 }
  0xad   : > { %498 = vmatmul.bf16.gmra.mxu1 %v410_v47 }
  0xae   : > { %v363_v48 = vpop.f32.mrf.mxu0 }
  0xaf   : > { %v364_v49 = vadd.f32 %v998_v34, %v363_v48 }
  0xb1   : > { %v397_v52 = vmax.f32 %v364_v49, 0.0 }
  0xb6   : > { %v365_v50 = vpop.f32.mrf.mxu0 }
  0xb7   : > { %v366_v51 = vadd.f32 %v998_v34, %v365_v50 }
  0xb9   : > { %v398_v53 = vmax.f32 %v366_v51, 0.0 }
  0xbb   : > { %v411_v54 = vpack.c.bf16 %v398_v53, %v397_v52 }
  0xbd   : > { %503 = vmatmul.bf16.gmra.mxu1 %v411_v54 }
  0xbe   : > { %v368_v55 = vpop.f32.mrf.mxu0 }
  0xbf   : > { %v369_v56 = vadd.f32 %v998_v34, %v368_v55 }
  0xc1   : > { %v399_v59 = vmax.f32 %v369_v56, 0.0 }
  0xc6   : > { %v370_v57 = vpop.f32.mrf.mxu0 }
  0xc7   : > { %v371_v58 = vadd.f32 %v998_v34, %v370_v57 }
  0xc9   : > { %v400_v60 = vmax.f32 %v371_v58, 0.0 }
  0xcb   : > { %v412_v61 = vpack.c.bf16 %v400_v60, %v399_v59 }
  0xcd   : > { %508 = vmatmul.bf16.gmra.mxu1 %v412_v61 }
  0xce   : > { %v373_v62 = vpop.f32.mrf.mxu0 }
  0xcf   : > { %v374_v63 = vadd.f32 %v998_v34, %v373_v62 }
  0xd1   : > { %v401_v2 = vmax.f32 %v374_v63, 0.0 }
  0xd6   : > { %v375_v0 = vpop.f32.mrf.mxu0 }
  0xd7   : > { %v376_v1 = vadd.f32 %v998_v34, %v375_v0 }
  0xd9   : > { %v402_v3 = vmax.f32 %v376_v1, 0.0 }
  0xdb   : > { %v413_v4 = vpack.c.bf16 %v402_v3, %v401_v2 }
  0xdd   : > { %513 = vmatmul.bf16.gmra.mxu1 %v413_v4 }
  0xde   : > { %v378_v5 = vpop.f32.mrf.mxu0 }
  0xdf   : > { %v379_v6 = vadd.f32 %v998_v34, %v378_v5 }
  0xe1   : > { %v403_v10 = vmax.f32 %v379_v6, 0.0 }
  0xe6   : > { %v380_v7 = vpop.f32.mrf.mxu0 }
  0xe7   : > { %v381_v8 = vadd.f32 %v998_v34, %v380_v7 }
  0xe9   : > { %v404_v11 = vmax.f32 %v381_v8, 0.0 }
  0xeb   : > { %v414_v12 = vpack.c.bf16 %v404_v11, %v403_v10 }
  0xed   : > { %518 = vmatmul.bf16.gmra.mxu1 %v414_v12 }
  0xee   : > { %v383_v14 = vpop.f32.mrf.mxu0 }
  0xef   : > { %v384_v17 = vadd.f32 %v998_v34, %v383_v14 }
  0xf1   : > { %v405_v21 = vmax.f32 %v384_v17, 0.0 }
  0xf6   : > { %v385_v18 = vpop.f32.mrf.mxu0 }
  0xf7   : > { %v386_v19 = vadd.f32 %v998_v34, %v385_v18 }
  0xf9   : > { %v406_v22 = vmax.f32 %v386_v19, 0.0 }
  0xfb   : > { %v415_v23 = vpack.c.bf16 %v406_v22, %v405_v21 }
  0xfd   : > { %523 = vmatmul.bf16.vlgmr.msra.gmra.mxu3 %v415_v23 }
  0xfe   : > { %v388_v25 = vpop.f32.mrf.mxu0 }
  0xff   : > { %v389_v28 = vadd.f32 %v998_v34, %v388_v25 }
 0x101   : > { %v407_v31 = vmax.f32 %v389_v28, 0.0 }
 0x106   : > { %v390_v29 = vpop.f32.mrf.mxu0 }
 0x107   : > { %v391_v30 = vadd.f32 %v998_v34, %v390_v29 }
 0x109   : > { %v408_v32 = vmax.f32 %v391_v30, 0.0 }
 0x10b   : > { %v416_v33 = vpack.c.bf16 %v408_v32, %v407_v31 }
 0x10d   : > { %528 = vmatmul.bf16.gmra.mxu3 %v416_v33 }
 0x11a   : > { %v494_v35 = vpop.f32.mrf.mxu1 }
 0x11b   : > { %v495_v37 = vadd.f32 %v876_v36, %v494_v35 }
 0x11d   : > { %v534_v40 = vmax.f32 %v495_v37, 0.0 }
 0x122   : > { %v496_v38 = vpop.f32.mrf.mxu1 }
 0x123   : > { %v497_v39 = vadd.f32 %v876_v36, %v496_v38 }
 0x125   : > { %v535_v41 = vmax.f32 %v497_v39, 0.0 }
 0x127   : > { %v550_v42 = vpack.c.bf16 %v535_v41, %v534_v40 }
 0x129   : > { %634 = vmatmul.bf16.vlgmr.msra.gmra.mxu2 %v550_v42 }
 0x12a   : > { %v499_v43 = vpop.f32.mrf.mxu1 }
 0x12b   : > { %v500_v44 = vadd.f32 %v876_v36, %v499_v43 }
 0x12d   : > { %v536_v46 = vmax.f32 %v500_v44, 0.0 }
 0x132   : > { %v501_v45 = vpop.f32.mrf.mxu1 }
 0x133   : > { %v502_v34 = vadd.f32 %v876_v36, %v501_v45 }
 0x135   : > { %v537_v47 = vmax.f32 %v502_v34, 0.0 }
 0x137   : > { %v551_v48 = vpack.c.bf16 %v537_v47, %v536_v46 }
 0x139   : > { %639 = vmatmul.bf16.gmra.mxu2 %v551_v48 }
 0x13a   : > { %v504_v49 = vpop.f32.mrf.mxu1 }
 0x13b   : > { %v505_v50 = vadd.f32 %v876_v36, %v504_v49 }
 0x13d   : > { %v538_v53 = vmax.f32 %v505_v50, 0.0 }
 0x142   : > { %v506_v51 = vpop.f32.mrf.mxu1 }
 0x143   : > { %v507_v52 = vadd.f32 %v876_v36, %v506_v51 }
 0x145   : > { %v539_v54 = vmax.f32 %v507_v52, 0.0 }
 0x147   : > { %v552_v55 = vpack.c.bf16 %v539_v54, %v538_v53 }
 0x149   : > { %644 = vmatmul.bf16.gmra.mxu2 %v552_v55 }
 0x14a   : > { %v509_v56 = vpop.f32.mrf.mxu1 }
 0x14b   : > { %v510_v57 = vadd.f32 %v876_v36, %v509_v56 }
 0x14d   : > { %v540_v60 = vmax.f32 %v510_v57, 0.0 }
 0x152   : > { %v511_v58 = vpop.f32.mrf.mxu1 }
 0x153   : > { %v512_v59 = vadd.f32 %v876_v36, %v511_v58 }
 0x155   : > { %v541_v61 = vmax.f32 %v512_v59, 0.0 }
 0x157   : > { %v553_v62 = vpack.c.bf16 %v541_v61, %v540_v60 }
 0x159   : > { %649 = vmatmul.bf16.gmra.mxu2 %v553_v62 }
 0x15a   : > { %v514_v63 = vpop.f32.mrf.mxu1 }
 0x15b   : > { %v515_v0 = vadd.f32 %v876_v36, %v514_v63 }
 0x15d   : > { %v542_v3 = vmax.f32 %v515_v0, 0.0 }
 0x162   : > { %v516_v1 = vpop.f32.mrf.mxu1 }
 0x163   : > { %v517_v2 = vadd.f32 %v876_v36, %v516_v1 }
 0x165   : > { %v543_v4 = vmax.f32 %v517_v2, 0.0 }
 0x167   : > { %v554_v5 = vpack.c.bf16 %v543_v4, %v542_v3 }
 0x169   : > { %654 = vmatmul.bf16.gmra.mxu2 %v554_v5 }
 0x16a   : > { %v519_v6 = vpop.f32.mrf.mxu1 }
 0x16b   : > { %v520_v7 = vadd.f32 %v876_v36, %v519_v6 }
 0x16d   : > { %v544_v10 = vmax.f32 %v520_v7, 0.0 }
 0x172   : > { %v521_v8 = vpop.f32.mrf.mxu1 }
 0x173   : > { %v522_v9 = vadd.f32 %v876_v36, %v521_v8 }
 0x175   : > { %v545_v11 = vmax.f32 %v522_v9, 0.0 }
 0x177   : > { %v555_v12 = vpack.c.bf16 %v545_v11, %v544_v10 }
 0x179   : > { %659 = vmatmul.bf16.gmra.mxu2 %v555_v12 }
 0x180   : > { %v524_v13 = vpop.f32.mrf.mxu3 }
 0x181   : > { %v525_v14 = vadd.f32 %v876_v36, %v524_v13 }
 0x183   : > { %v546_v17 = vmax.f32 %v525_v14, 0.0 }
 0x188   : > { %v526_v15 = vpop.f32.mrf.mxu3 }
 0x189   : > { %v527_v16 = vadd.f32 %v876_v36, %v526_v15 }
 0x18b   : > { %v547_v18 = vmax.f32 %v527_v16, 0.0 }
 0x18d   : > { %v556_v19 = vpack.c.bf16 %v547_v18, %v546_v17 }
 0x18f   : > { %664 = vmatmul.bf16.vlgmr.msrb.gmra.mxu3 %v556_v19 }
 0x190   : > { %v529_v20 = vpop.f32.mrf.mxu3 }
 0x191   : > { %v530_v21 = vadd.f32 %v876_v36, %v529_v20 }
 0x193   : > { %v548_v24 = vmax.f32 %v530_v21, 0.0 }
 0x198   : > { %v531_v22 = vpop.f32.mrf.mxu3 }
 0x199   : > { %v532_v23 = vadd.f32 %v876_v36, %v531_v22 }
 0x19b   : > { %v549_v25 = vmax.f32 %v532_v23, 0.0 }
 0x19d   : > { %v557_v26 = vpack.c.bf16 %v549_v25, %v548_v24 }
 0x19f   : > { %669 = vmatmul.bf16.gmra.mxu3 %v557_v26 }
 0x1ac   : > { %v635_v28 = vpop.f32.mrf.mxu2 }
 0x1ad   : > { %v636_v29 = vadd.f32 %v877_v27, %v635_v28 }
 0x1af   : > { %675 = vst [vmem:[%s1051_s10] sm:$0xff] %v636_v29 }
 0x1b4   : > { %v637_v30 = vpop.f32.mrf.mxu2 }
 0x1b5   : > { %v638_v31 = vadd.f32 %v877_v27, %v637_v30 }
 0x1b7   : > { %676 = vst [vmem:[%s1051_s10 + $0x8] sm:$0xff] %v638_v31 }
 0x1bc   : > { %v640_v32 = vpop.f32.mrf.mxu2 }
 0x1bd   : > { %v641_v33 = vadd.f32 %v877_v27, %v640_v32 }
 0x1bf   : > { %677 = vst [vmem:[%s1051_s10 + $0x10] sm:$0xff] %v641_v33 }
 0x1c4   : > { %v642_v35 = vpop.f32.mrf.mxu2 }
 0x1c5   : > { %v643_v36 = vadd.f32 %v877_v27, %v642_v35 }
 0x1c7   : > { %678 = vst [vmem:[%s1051_s10 + $0x18] sm:$0xff] %v643_v36 }
 0x1cc   : > { %v645_v37 = vpop.f32.mrf.mxu2 }
 0x1cd   : > { %v646_v38 = vadd.f32 %v877_v27, %v645_v37 }
 0x1cf   : > { %679 = vst [vmem:[%s1051_s10 + $0x20] sm:$0xff] %v646_v38 }
 0x1d4   : > { %v647_v39 = vpop.f32.mrf.mxu2 }
 0x1d5   : > { %v648_v40 = vadd.f32 %v877_v27, %v647_v39 }
 0x1d7   : > { %680 = vst [vmem:[%s1051_s10 + $0x28] sm:$0xff] %v648_v40 }
 0x1dc   : > { %v650_v41 = vpop.f32.mrf.mxu2 }
 0x1dd   : > { %v651_v42 = vadd.f32 %v877_v27, %v650_v41 }
 0x1df   : > { %681 = vst [vmem:[%s1051_s10 + $0x30] sm:$0xff] %v651_v42 }
 0x1e4   : > { %v652_v43 = vpop.f32.mrf.mxu2 }
 0x1e5   : > { %v653_v44 = vadd.f32 %v877_v27, %v652_v43 }
 0x1e7   : > { %682 = vst [vmem:[%s1051_s10 + $0x38] sm:$0xff] %v653_v44 }
 0x1ec   : > { %v655_v45 = vpop.f32.mrf.mxu2 }
 0x1ed   : > { %v656_v34 = vadd.f32 %v877_v27, %v655_v45 }
 0x1ef   : > { %683 = vst [vmem:[%s1051_s10 + $0x40] sm:$0xff] %v656_v34 }
 0x1f4   : > { %v657_v46 = vpop.f32.mrf.mxu2 }
 0x1f5   : > { %v658_v47 = vadd.f32 %v877_v27, %v657_v46 }
 0x1f7   : > { %684 = vst [vmem:[%s1051_s10 + $0x48] sm:$0xff] %v658_v47 }
 0x1fc   : > { %v660_v48 = vpop.f32.mrf.mxu2 }
 0x1fd   : > { %v661_v49 = vadd.f32 %v877_v27, %v660_v48 }
 0x1ff   : > { %685 = vst [vmem:[%s1051_s10 + $0x50] sm:$0xff] %v661_v49 }
 0x204   : > { %v662_v50 = vpop.f32.mrf.mxu2 }
 0x205   : > { %v663_v51 = vadd.f32 %v877_v27, %v662_v50 }
 0x207   : > { %686 = vst [vmem:[%s1051_s10 + $0x58] sm:$0xff] %v663_v51 }
 0x212   : > { %v665_v52 = vpop.f32.mrf.mxu3 }
 0x213   : > { %v666_v53 = vadd.f32 %v877_v27, %v665_v52 }
 0x215   : > { %687 = vst [vmem:[%s1051_s10 + $0x60] sm:$0xff] %v666_v53 }
 0x21a   : > { %v667_v54 = vpop.f32.mrf.mxu3 }
 0x21b   : > { %v668_v55 = vadd.f32 %v877_v27, %v667_v54 }
 0x21d   : > { %688 = vst [vmem:[%s1051_s10 + $0x68] sm:$0xff] %v668_v55 }
 0x222   : > { %v670_v56 = vpop.f32.mrf.mxu3 }
 0x223   : > { %v671_v57 = vadd.f32 %v877_v27, %v670_v56 }
 0x225   : > { %689 = vst [vmem:[%s1051_s10 + $0x70] sm:$0xff] %v671_v57 }
 0x22a   : > { %v672_v58 = vpop.f32.mrf.mxu3 }
 0x22b   : > { %v673_v59 = vadd.f32 %v877_v27, %v672_v58 }
 0x22d   : > { %690 = vst [vmem:[%s1051_s10 + $0x78] sm:$0xff] %v673_v59 }
 0x22e PF: > { %s17_s24 = sadd.s32 1, %s884_s24  }
 0x22f   : > { %p14_p4 = scmp.ge.s32.totalorder %s17_s24, 4  }
 0x231   :  { %16 = sbr.rel (!%p14_p4) target bundleno = 1 (0x1), region = 78 }

</bundles_post_ra>
